<compile_context>
chip_gen: v6e
topology: v6e:2x2x1
jax: 0.10.0
libtpu: 0.0.40
codegen_flags: <defaults>
</compile_context>

<pallas_src>
import functools

import jax
import jax.numpy as jnp
from jax.experimental import pallas as pl
from jax.experimental.pallas import tpu as pltpu


_VMEM_LIMIT_CACHE = None
# Only request single-buffering of the resident weight when the lane-padded
# copy is big enough for the saved second buffer to matter.
_SINGLE_BUFFER_WEIGHT_BYTES = 2 * 1024 * 1024


def _round_up(x, m):
    return ((x + m - 1) // m) * m


def _vmem_limit_bytes():
    """Generation-aware scoped-VMEM budget (v5e/v6e: 128 MiB phys, v7x: 64 MiB)."""
    global _VMEM_LIMIT_CACHE
    if _VMEM_LIMIT_CACHE is None:
        cap = None
        try:
            get_info = getattr(pltpu, "get_tpu_info", None)
            if get_info is not None:
                cap = getattr(get_info(), "vmem_capacity_bytes", None)
        except Exception:
            cap = None
        if not cap or cap <= 0:
            cap = 64 * 1024 * 1024  # conservative fallback: assume v7x per-TC VMEM
        # Leave more headroom on the small-VMEM generation (v7x).
        frac = 0.70 if cap >= 100 * 1024 * 1024 else 0.55
        _VMEM_LIMIT_CACHE = int(cap * frac)
    return _VMEM_LIMIT_CACHE


def _linear_kernel(x_ref, wt_ref, b_ref, o_ref):
    # x_ref:  (TM, F)  streaming batch tile
    # wt_ref: (F, C)   VMEM-resident, pre-transposed weight (native MXU layout)
    # b_ref:  (1, C)   VMEM-resident bias
    # o_ref:  (TM, C)
    acc = jnp.dot(x_ref[...], wt_ref[...], preferred_element_type=jnp.float32)
    o_ref[...] = (acc + b_ref[...]).astype(o_ref.dtype)
    # TODO(synk): if a downstream sigmoid/softmax is ever applied to the
    # logits, fuse it here (EUP slot is idle in this mem-bound kernel).


def _pick_tm(batch, feat_dim, n_classes, x_itemsize, out_itemsize, vmem_limit):
    """Largest batch tile (multiple of 8, <= 1024) fitting the VMEM budget.

    Accounts for lane (128) / sublane (8) padding of narrow tiles and for
    Pallas double-buffering every BlockSpec operand (resident weight counted
    twice to stay conservative even when Buffered(1) is honored).
    """
    if batch <= 8:
        return batch  # single full-extent block

    f_lane = _round_up(feat_dim, 128)
    c_lane = _round_up(n_classes, 128)
    f_sub = _round_up(feat_dim, 8)

    # Resident operands: weight [F, C] (+ 2x buffers) and bias [1, C] -> (8, C).
    resident = 2 * (x_itemsize * f_sub * c_lane + 4 * 8 * c_lane)
    # Streaming bytes per batch row: x row + out row, each double-buffered.
    per_row = 2 * (x_itemsize * f_lane + out_itemsize * c_lane)

    budget = int(vmem_limit * 0.85) - resident
    max_rows = max(8, budget // max(per_row, 1))

    tm = min(1024, (batch // 8) * 8, (max_rows // 8) * 8)
    tm = max(tm, 8)

    # Ensure >= 2 grid steps so the "parallel" batch axis can be sharded over
    # v7x's two TensorCores (two steps are essentially free elsewhere).
    if batch >= 16 and pl.cdiv(batch, tm) < 2:
        tm = max(8, ((tm // 2) // 8) * 8)
    return tm


def _resident_spec(block_shape, single_buffer):
    """Constant-index (VMEM-resident) operand spec; single-buffered if possible."""
    index_map = lambda i: (0, 0)
    if single_buffer:
        try:
            return pl.BlockSpec(block_shape, index_map,
                                pipeline_mode=pl.Buffered(1))
        except Exception:
            pass  # fall back to the default (double-buffered) spec
    return pl.BlockSpec(block_shape, index_map)


@functools.partial(jax.jit, static_argnames=("compute_dtype",))
def logistic_regress_evaluator(x, weight, bias, *, compute_dtype=None):
    """Forward pass of LogisticRegressEvaluator (a single nn.Linear).

    Args:
      x:      [batch, feat_dim]
      weight: [n_classes, feat_dim]  (PyTorch nn.Linear layout)
      bias:   [n_classes]
      compute_dtype: optional narrower streaming dtype (e.g. jnp.bfloat16) for
        the HBM-bound x/weight reads; accumulation stays f32.
    Returns:
      [batch, n_classes] logits in x's original dtype.
    """
    batch, feat_dim = x.shape
    n_classes = weight.shape[0]
    out_dtype = x.dtype

    if compute_dtype is not None:
        x = x.astype(compute_dtype)
        weight = weight.astype(compute_dtype)

    # One-time tiny transpose of the [C, F] weight -> [F, C]: native RHS
    # orientation for the MXU (n_classes lands on lanes).
    w_t = weight.T
    b2 = bias.reshape(1, n_classes).astype(jnp.float32)

    x_itemsize = jnp.dtype(x.dtype).itemsize
    out_itemsize = jnp.dtype(out_dtype).itemsize
    vmem_limit = _vmem_limit_bytes()

    tm = _pick_tm(batch, feat_dim, n_classes, x_itemsize, out_itemsize, vmem_limit)
    grid = (pl.cdiv(batch, tm),)  # ragged last block instead of jnp.pad

    w_padded_bytes = (_round_up(feat_dim, 8) * _round_up(n_classes, 128)
                      * x_itemsize)
    single_buffer_w = w_padded_bytes >= _SINGLE_BUFFER_WEIGHT_BYTES

    cost = pl.CostEstimate(
        flops=2 * batch * feat_dim * n_classes,
        transcendentals=0,
        bytes_accessed=(batch * feat_dim * x_itemsize      # x stream
                        + feat_dim * n_classes * x_itemsize  # weight (once)
                        + batch * n_classes * out_itemsize    # output
                        + n_classes * 4),                     # bias
    )

    out = pl.pallas_call(
        _linear_kernel,
        out_shape=jax.ShapeDtypeStruct((batch, n_classes), out_dtype),
        grid_spec=pltpu.PrefetchScalarGridSpec(
            num_scalar_prefetch=0,
            grid=grid,
            in_specs=[
                # Streaming batch tiles of x (double-buffered DMA).
                pl.BlockSpec((tm, feat_dim), lambda i: (i, 0)),
                # VMEM-resident transposed weight and bias.
                _resident_spec((feat_dim, n_classes), single_buffer_w),
                _resident_spec((1, n_classes), False),
            ],
            out_specs=pl.BlockSpec((tm, n_classes), lambda i: (i, 0)),
        ),
        compiler_params=pltpu.CompilerParams(
            dimension_semantics=("parallel",),
            vmem_limit_bytes=vmem_limit,
        ),
        cost_estimate=cost,
    )(x, w_t, b2)

    return out


if __name__ == "__main__":
    feat_dim, n_classes = 32, 16

    key = jax.random.PRNGKey(0)
    kx, kw, kx2 = jax.random.split(key, 3)

    # Deterministic parameter init matching the module's __init__:
    # weight ~ N(0, 0.01), bias = 0.
    weight = 0.01 * jax.random.normal(kw, (n_classes, feat_dim), jnp.float32)
    bias = jnp.zeros((n_classes,), jnp.float32)

    # Case 1: small, tile-aligned batch.
    x = jax.random.normal(kx, (8, feat_dim), jnp.float32)
    out = logistic_regress_evaluator(x, weight, bias)
    jax.block_until_ready(out)
    ref = x @ weight.T + bias
    assert out.shape == (8, n_classes)
    assert jnp.allclose(out, ref, atol=1e-5, rtol=1e-5)

    # Case 2: ragged batch (exercises the no-pad edge-block path).
    x2 = jax.random.normal(kx2, (13, feat_dim), jnp.float32)
    out2 = logistic_regress_evaluator(x2, weight, bias)
    jax.block_until_ready(out2)
    ref2 = x2 @ weight.T + bias
    assert out2.shape == (13, n_classes)
    assert jnp.allclose(out2, ref2, atol=1e-5, rtol=1e-5)

    print("KERNEL_OK")
</pallas_src>

<mosaic_0001>
module attributes {stable_mosaic.version = 11 : i64} {
  func.func @_linear_kernel(%arg0: i32, %arg1: memref<8x32xf32, #tpu.memory_space<vmem>>, %arg2: memref<32x16xf32, #tpu.memory_space<vmem>>, %arg3: memref<1x16xf32, #tpu.memory_space<vmem>>, %arg4: memref<8x16xf32, #tpu.memory_space<vmem>>) attributes {dimension_semantics = [#tpu.dimension_semantics<parallel>], iteration_bounds = array<i64: 1>, scalar_prefetch = 0 : i64, scratch_operands = 0 : i64, tpu.core_type = #tpu.core_type<tc>, window_params = [{transform_indices = @transform_0, window_bounds = array<i64: 8, 32>}, {pipeline_mode = #tpu.pipeline_mode<synchronous>, transform_indices = @transform_1, window_bounds = array<i64: 32, 16>}, {pipeline_mode = #tpu.pipeline_mode<synchronous>, transform_indices = @transform_2, window_bounds = array<i64: 1, 16>}, {transform_indices = @transform_3, window_bounds = array<i64: 8, 16>}]} {
    %c0 = arith.constant 0 : index
    %c0_0 = arith.constant 0 : index
    %0 = vector.load %arg1[%c0, %c0_0] : memref<8x32xf32, #tpu.memory_space<vmem>>, vector<8x32xf32>
    %c0_1 = arith.constant 0 : index
    %c0_2 = arith.constant 0 : index
    %1 = vector.load %arg2[%c0_1, %c0_2] : memref<32x16xf32, #tpu.memory_space<vmem>>, vector<32x16xf32>
    %cst = arith.constant dense<0.000000e+00> : vector<8x16xf32>
    %2 = tpu.matmul %0, %1, %cst {dimension_numbers = #tpu.dot_dimension_numbers<[1], [0], [0], [1], [0, 0, 1, 1], [], []>} : vector<8x32xf32>, vector<32x16xf32>, vector<8x16xf32> -> vector<8x16xf32>
    %c0_3 = arith.constant 0 : index
    %c0_4 = arith.constant 0 : index
    %3 = vector.load %arg3[%c0_3, %c0_4] : memref<1x16xf32, #tpu.memory_space<vmem>>, vector<1x16xf32>
    %4 = vector.broadcast %3 : vector<1x16xf32> to vector<8x16xf32>
    %5 = arith.addf %2, %4 : vector<8x16xf32>
    %c0_5 = arith.constant 0 : index
    %c0_6 = arith.constant 0 : index
    %6 = vector.load %arg4[%c0_5, %c0_6] : memref<8x16xf32, #tpu.memory_space<vmem>>, vector<8x16xf32>
    tpu.vector_store %arg4[%c0_5, %c0_6], %5 {strides = array<i32>} : memref<8x16xf32, #tpu.memory_space<vmem>>, vector<8x16xf32>,
    return
  }
  func.func @transform_0(%arg0: i32) -> (i32, i32) {
    %c0_i32 = arith.constant 0 : i32
    %c0_i32_0 = arith.constant 0 : i32
    return %arg0, %c0_i32 : i32, i32
  }
  func.func @transform_1(%arg0: i32) -> (i32, i32) {
    %c0_i32 = arith.constant 0 : i32
    %c0_i32_0 = arith.constant 0 : i32
    %c0_i32_1 = arith.constant 0 : i32
    return %c0_i32, %c0_i32_0 : i32, i32
  }
  func.func @transform_2(%arg0: i32) -> (i32, i32) {
    %c0_i32 = arith.constant 0 : i32
    %c0_i32_0 = arith.constant 0 : i32
    %c0_i32_1 = arith.constant 0 : i32
    return %c0_i32, %c0_i32_0 : i32, i32
  }
  func.func @transform_3(%arg0: i32) -> (i32, i32) {
    %c0_i32 = arith.constant 0 : i32
    %c0_i32_0 = arith.constant 0 : i32
    return %arg0, %c0_i32 : i32, i32
  }
}

</mosaic_0001>

<bundles_post_ra>
// kernel: logistic_regress_evaluator.1
= control target key start
LH: loop header
LB: loop body
LE: loop exit
PB: predicated region body
PF: predicated region fallthrough
CT: control target
= control target key end

     0   :  { %v160_v1 = vmov 0.0   ;;  %vm161_vm0 = vmmov 0   ;;  %s204_s0 = inlined_call_operand.vmem [shape: f32[8,32], index: 0, kind: input, shape index: {}]   ;;  %s205_s1 = inlined_call_operand.vmem [shape: f32[32,16], index: 1, kind: input, shape index: {}]   ;;  %s206_s2 = inlined_call_operand.vmem [shape: f32[1,16], index: 2, kind: input, shape index: {}]   ;;  %s207_s3 = inlined_call_operand.hbm [shape: f32[8,16], index: 3, kind: output, shape index: {}]  }
   0x1   :  { %v19_v0 = vld [vmem:[%s205_s1 + $0x18] sm:$0xff]  ;;  %124 = vmatprep.subr.mxu0 %v160_v1  ;;  %v18_v2 = vld [vmem:[%s205_s1 + $0x10] sm:$0xff]  ;;  %132 = vmatprep.mubr.msk.f32.mxu0 %vm161_vm0, %v160_v1 }
   0x2   :  { %125 = vmatpush3.msra.mxu0 %v19_v0 }
   0x3   :  { %8 = vsyncpa [#allocation3], 0  ;;  %126 = vmatprep.subr.mxu0 %v160_v1  ;;  %v17_v3 = vld [vmem:[%s205_s1 + $0x8] sm:$0xff]  ;;  %v16_v4 = vld [vmem:[%s205_s1] sm:$0xff]  ;;  %vm27_vm1 = vcmask 261120   ;;  %s162_s24 = smov [#allocation2]  }
   0x4   :  { %127 = vmatpush3.msra.mxu0 %v18_v2  ;;  %v15_v5 = vld [vmem:[%s204_s0] sm:$0xff]  ;;  %s109_s25 = sshll.u32 %s162_s24, 4  ;;  %vm101_vm2 = vcmask 130048   ;;  %s110_s25 = int_to_ptr.vmem [resolvable:$true] %s109_s25 }
   0x5   :  { %128 = vmatprep.subr.mxu0 %v160_v1  ;;  %v117_v6 = vld [vmem:[%s206_s2] ss:$0 sm:$0xff]  ;;  %s138_s1 = scalar_lea.vmem %s110_s25, 128  ;;  %p143_p1 = scmp.lt.s32.totalorder %s110_s25, %s110_s25 }
   0x6   :  { %129 = vmatpush3.msra.mxu0 %v17_v3  ;;  %p139_p0 = scmp.ne.s32.totalorder %s110_s25, %s138_s1  ;;  %p144_p2 = scmp.lt.s32.totalorder %s138_s1, %s138_s1 }
   0x7   :  { %130 = vmatprep.subr.mxu0 %v160_v1 }
   0x8   :  { %131 = vmatpush3.msra.mxu0 %v16_v4  ;;  %p145_p3 = por %p144_p2, %p143_p1 }
   0x9   :  { %133 = vmatmul.mubr.msk.f32.vlgmr.msra.gmra.mxu0 %vm27_vm1, %v15_v5 }
   0xa   :  { %p146_p4 = pnand %p145_p3, %p139_p0 }
  0xc9   :  { %v97_v7 = vpop.f32.mrf.mxu0 }
  0xca   :  { %v98_v8 = vadd.f32 %v117_v6, %v97_v7 }
  0xcb   :  { %v134_v9 = vpop.f32.mrf.mxu0 }
  0xcc   :  { %102 = vst.msk [vmem:[#allocation2] sm:$0xff] %vm101_vm2, %v98_v8 }
  0xcd   :  { %149 = shalt.err (!%p146_p4)
}
  0xce   :  { %112 = dma.vmem_to_hbm [thread:$0]  %s110_s25, 128, %s207_s3, [#allocation3]  }
  0xcf   :  { %158 = dma.done.wait [#allocation3], 128  }
  0xd0   :  { %159 = vsyncadd [#allocation3], 4294967168 }
  0xd1   :  { %116 = vsyncpa [#allocation3], 1 }

</bundles_post_ra>
